<compile_context>
chip_gen: v7x
topology: tpu7x:2x2x1
jax: 0.10.0
libtpu: 0.0.40
codegen_flags: <defaults>
</compile_context>

<pallas_src>
import functools

import jax
import jax.numpy as jnp
import numpy as np
from jax import lax
from jax.experimental import pallas as pl
from jax.experimental.pallas import tpu as pltpu


def _round_up(x, m):
    return (x + m - 1) // m * m


def _taps(K):
    pad = K // 2
    return [(kh - pad, kw - pad) for kh in range(K) for kw in range(K)]


# ---------------------------------------------------------------------------
# Fused kernel: conv1 -> relu -> GN1 -> conv2 -> (+x) -> GN2 -> (+z) -> relu
#               -> GN3.  One grid step processes B_blk samples; the
#               intermediate y never leaves VMEM.
# ---------------------------------------------------------------------------
def _make_fused_kernel(H, W, Cin, Cinner, K, eps, B_blk, CP1, CP2):
    HW = H * W
    N = B_blk * HW
    taps = _taps(K)
    # shifted[l] = v[(l + dh*W + dw) mod N]  ->  roll shift = -(dh*W + dw)
    shifts = [(-(dh * W + dw)) % N for (dh, dw) in taps]

    def kernel(z_ref, x_ref, m_ref, w1_ref, w2_ref, avg1_ref, avg2_ref,
               g1w_ref, g1b_ref, g2w_ref, g2b_ref, g3w_ref, g3b_ref,
               o_ref, patch1_ref, patch2_ref):
        # ---- hoisted, loop-invariant loads ----
        z = z_ref[...]                      # (Cin, N)
        x = x_ref[...]                      # (Cin, N)
        masks = m_ref[...]                  # (K*K, N) 0/1 f32
        w1 = w1_ref[...]                    # (Cinner, K*K*CP1)
        w2 = w2_ref[...]                    # (Cin,    K*K*CP2)
        avg1 = avg1_ref[...]                # (Cinner, Cinner)
        avg2 = avg2_ref[...]                # (Cin, Cin)
        g1w, g1b = g1w_ref[...], g1b_ref[...]
        g2w, g2b = g2w_ref[...], g2b_ref[...]
        g3w, g3b = g3w_ref[...], g3b_ref[...]

        def im2col(v, patch_ref, C, CP):
            # Whole-block im2col: K*K rolls + mask multiplies over (CP, N),
            # every store a full 8-sublane group at an 8-aligned offset.  The
            # padding rows are rewritten every step, so no init is needed.
            if CP > C:
                v = jnp.concatenate(
                    [v, jnp.zeros((CP - C, N), jnp.float32)], axis=0)
            for t, (dh, dw) in enumerate(taps):
                if shifts[t] == 0:
                    shifted = v
                else:
                    shifted = pltpu.roll(v, shift=shifts[t], axis=1)
                if dh == 0 and dw == 0:
                    masked = shifted
                else:
                    masked = shifted * masks[t:t + 1, :]
                patch_ref[t * CP:(t + 1) * CP, :] = masked

        def groupnorm(v, avg, gamma, beta):
            # v: (C, N).  Lane sums per sample first (XLU), then a tiny
            # (C, C) x (C, B_blk) group-mix matmul; normalize per sample on
            # lane-aligned slices; single batched scale/shift at the end.
            s1, s2 = [], []
            for s in range(B_blk):
                vs = v[:, s * HW:(s + 1) * HW]
                s1.append(jnp.sum(vs, axis=1, keepdims=True))
                s2.append(jnp.sum(vs * vs, axis=1, keepdims=True))
            S1 = jnp.concatenate(s1, axis=1) if B_blk > 1 else s1[0]
            S2 = jnp.concatenate(s2, axis=1) if B_blk > 1 else s2[0]
            mu = jnp.dot(avg, S1, preferred_element_type=jnp.float32)
            ex2 = jnp.dot(avg, S2, preferred_element_type=jnp.float32)
            rstd = lax.rsqrt(jnp.maximum(ex2 - mu * mu, 0.0) + eps)
            parts = []
            for s in range(B_blk):
                vs = v[:, s * HW:(s + 1) * HW]
                parts.append((vs - mu[:, s:s + 1]) * rstd[:, s:s + 1])
            vn = jnp.concatenate(parts, axis=1) if B_blk > 1 else parts[0]
            return vn * gamma + beta

        # ---- stage 1: y = GN1(relu(conv1(z))) ----
        im2col(z, patch1_ref, Cin, CP1)
        a = jnp.dot(w1, patch1_ref[...],
                    preferred_element_type=jnp.float32)       # (Cinner, N)
        y = groupnorm(jnp.maximum(a, 0.0), avg1, g1w, g1b)

        # ---- stage 2: out = GN3(relu(z + GN2(x + conv2(y)))) ----
        im2col(y, patch2_ref, Cinner, CP2)
        c2 = jnp.dot(w2, patch2_ref[...],
                     preferred_element_type=jnp.float32)      # (Cin, N)
        t2 = groupnorm(x + c2, avg2, g2w, g2b)
        u = jnp.maximum(z + t2, 0.0)
        o_ref[...] = groupnorm(u, avg2, g3w, g3b)

    return kernel


# ---------------------------------------------------------------------------
# Wrapper glue (layout plumbing + tiny weight folding)
# ---------------------------------------------------------------------------
def _fold_conv_weight(w, cp):
    # (O, I, K, K) -> (O, K*K*cp); columns ordered (tap-major, channel-minor),
    # channel axis zero-padded to cp to match the im2col scratch layout.
    O, I, K, _ = w.shape
    wt = jnp.transpose(w, (0, 2, 3, 1))                        # (O, K, K, I)
    wt = jnp.pad(wt, ((0, 0), (0, 0), (0, 0), (0, cp - I)))
    return wt.reshape(O, K * K * cp).astype(jnp.float32)


def _group_avg_matrix(C, G, HW):
    # (C, C) matrix M with M[c, c'] = 1/(cg*HW) if c, c' share a group.
    cg = C // G
    gid = np.arange(C) // cg
    m = (gid[:, None] == gid[None, :]).astype(np.float32) / float(cg * HW)
    return jnp.asarray(m)


def _boundary_masks(H, W, K, B_blk):
    # (K*K, B_blk*H*W) 0/1 f32: conv-halo validity per tap, tiled per sample.
    pos = np.arange(H * W)
    hh, ww = pos // W, pos % W
    rows = []
    for (dh, dw) in _taps(K):
        m = ((hh + dh >= 0) & (hh + dh < H) &
             (ww + dw >= 0) & (ww + dw < W)).astype(np.float32)
        rows.append(m)
    masks = np.stack(rows, axis=0)
    return jnp.asarray(np.tile(masks, (1, B_blk)))


def _pick_batch_block(B, Cin, Cinner, HW, KK, CP1, CP2):
    # Per-sample VMEM (f32 bytes):
    #   z/x/out blocks (double-buffered): 2*3*Cin*HW
    #   mask block (double-buffered):     2*KK*HW
    #   im2col scratches (single):        KK*(CP1+CP2)*HW
    #   live intermediates (rough):       6*max(Cin, Cinner)*HW
    per_sample = 4 * HW * (6 * Cin + 2 * KK + KK * (CP1 + CP2)
                           + 6 * max(Cin, Cinner))
    budget = 12 * 1024 * 1024          # fits v5e's 16 MiB default scoped VMEM
    blk = max(1, budget // max(per_sample, 1))
    blk = int(min(blk, 8, B))          # cap unrolled per-sample GN stat loops
    if B >= 2:
        blk = min(blk, max(1, B // 2))  # keep >= 2 grid steps (v7x megacore)
    blk = max(blk, 1)
    while B % blk:
        blk -= 1
    # Lane tiling: last block dim must be a multiple of 128 (or the full axis).
    if (blk * HW) % 128 != 0 and blk != B:
        blk = B
    return blk


@functools.partial(jax.jit, static_argnames=("num_groups", "eps"))
def deq_core_forward(z_nchw, x_nchw, params, *, num_groups, eps=1e-5):
    w1, w2 = params["w1"], params["w2"]
    B, Cin, H, W = z_nchw.shape
    Cinner = w1.shape[0]
    K = w1.shape[2]
    G = num_groups
    HW = H * W
    KK = K * K
    CP1 = _round_up(Cin, 8)
    CP2 = _round_up(Cinner, 8)
    B_blk = _pick_batch_block(B, Cin, Cinner, HW, KK, CP1, CP2)
    N = B_blk * HW

    # NCHW -> (Cin, B*HW): channels on sublanes, batch x spatial on lanes
    # (lane-dense loads/stores; batch widens the conv matmul N dimension).
    z = z_nchw.reshape(B, Cin, HW).transpose(1, 0, 2) \
              .reshape(Cin, B * HW).astype(jnp.float32)
    x = x_nchw.reshape(B, Cin, HW).transpose(1, 0, 2) \
              .reshape(Cin, B * HW).astype(jnp.float32)

    # NOTE: operands stay f32; casting patches/weights to bf16 (keeping f32
    # accumulation + GN math) is a throughput option but risks the 1e-3 check.
    w1_f = _fold_conv_weight(w1, CP1)          # (Cinner, K*K*CP1)
    w2_f = _fold_conv_weight(w2, CP2)          # (Cin,    K*K*CP2)
    avg1 = _group_avg_matrix(Cinner, G, HW)
    avg2 = _group_avg_matrix(Cin, G, HW)
    masks = _boundary_masks(H, W, K, B_blk)    # (K*K, N)

    g1w = params["g1w"].reshape(Cinner, 1).astype(jnp.float32)
    g1b = params["g1b"].reshape(Cinner, 1).astype(jnp.float32)
    g2w = params["g2w"].reshape(Cin, 1).astype(jnp.float32)
    g2b = params["g2b"].reshape(Cin, 1).astype(jnp.float32)
    g3w = params["g3w"].reshape(Cin, 1).astype(jnp.float32)
    g3b = params["g3b"].reshape(Cin, 1).astype(jnp.float32)

    kernel = _make_fused_kernel(H, W, Cin, Cinner, K, eps, B_blk, CP1, CP2)

    conv_flops = 2 * B * HW * KK * (CP1 * Cinner + CP2 * Cin)
    gn_flops = 8 * B * HW * (Cinner + 2 * Cin)
    cost = pl.CostEstimate(
        flops=int(conv_flops + gn_flops),
        transcendentals=int(B * (Cinner + 2 * Cin)),
        bytes_accessed=int(4 * (3 * B * Cin * HW + masks.size
                                + w1_f.size + w2_f.size)),
    )

    out = pl.pallas_call(
        kernel,
        out_shape=jax.ShapeDtypeStruct((Cin, B * HW), jnp.float32),
        grid_spec=pltpu.PrefetchScalarGridSpec(
            num_scalar_prefetch=0,
            grid=(B // B_blk,),
            in_specs=[
                pl.BlockSpec((Cin, N), lambda b: (0, b)),            # z
                pl.BlockSpec((Cin, N), lambda b: (0, b)),            # x
                pl.BlockSpec((KK, N), lambda b: (0, 0)),             # masks
                pl.BlockSpec((Cinner, KK * CP1), lambda b: (0, 0)),  # w1
                pl.BlockSpec((Cin, KK * CP2), lambda b: (0, 0)),     # w2
                pl.BlockSpec((Cinner, Cinner), lambda b: (0, 0)),    # avg1
                pl.BlockSpec((Cin, Cin), lambda b: (0, 0)),          # avg2
                pl.BlockSpec((Cinner, 1), lambda b: (0, 0)),         # g1w
                pl.BlockSpec((Cinner, 1), lambda b: (0, 0)),         # g1b
                pl.BlockSpec((Cin, 1), lambda b: (0, 0)),            # g2w
                pl.BlockSpec((Cin, 1), lambda b: (0, 0)),            # g2b
                pl.BlockSpec((Cin, 1), lambda b: (0, 0)),            # g3w
                pl.BlockSpec((Cin, 1), lambda b: (0, 0)),            # g3b
            ],
            out_specs=pl.BlockSpec((Cin, N), lambda b: (0, b)),
            scratch_shapes=[
                pltpu.VMEM((KK * CP1, N), jnp.float32),   # im2col for conv1
                pltpu.VMEM((KK * CP2, N), jnp.float32),   # im2col for conv2
            ],
        ),
        compiler_params=pltpu.CompilerParams(
            dimension_semantics=("parallel",),
            vmem_limit_bytes=40 * 1024 * 1024),
        cost_estimate=cost,
    )(z, x, masks, w1_f, w2_f, avg1, avg2, g1w, g1b, g2w, g2b, g3w, g3b)

    # (Cin, B*HW) -> NCHW
    return out.reshape(Cin, B, HW).transpose(1, 0, 2).reshape(B, Cin, H, W)


# ---------------------------------------------------------------------------
# Pure-JAX reference (for verification)
# ---------------------------------------------------------------------------
def _ref_groupnorm(x_nchw, gamma, beta, G, eps=1e-5):
    B, C, H, W = x_nchw.shape
    xg = x_nchw.reshape(B, G, C // G, H, W)
    mean = jnp.mean(xg, axis=(2, 3, 4), keepdims=True)
    var = jnp.mean((xg - mean) ** 2, axis=(2, 3, 4), keepdims=True)
    xn = ((xg - mean) * lax.rsqrt(var + eps)).reshape(B, C, H, W)
    return xn * gamma.reshape(1, C, 1, 1) + beta.reshape(1, C, 1, 1)


def _ref_conv(x_nchw, w_oihw, pad):
    return lax.conv_general_dilated(
        x_nchw, w_oihw, window_strides=(1, 1),
        padding=((pad, pad), (pad, pad)),
        dimension_numbers=("NCHW", "OIHW", "NCHW"))


def ref_forward(z, x, params, num_groups):
    K = params["w1"].shape[2]
    pad = K // 2
    y = _ref_groupnorm(jnp.maximum(_ref_conv(z, params["w1"], pad), 0.0),
                       params["g1w"], params["g1b"], num_groups)
    inner = _ref_groupnorm(x + _ref_conv(y, params["w2"], pad),
                           params["g2w"], params["g2b"], num_groups)
    return _ref_groupnorm(jnp.maximum(z + inner, 0.0),
                          params["g3w"], params["g3b"], num_groups)


# ---------------------------------------------------------------------------
if __name__ == "__main__":
    B, Cin, Cinner, H, W = 2, 4, 8, 16, 16
    K, G = 3, 2  # kernel_size=3, num_groups=2

    key = jax.random.PRNGKey(0)
    k1, k2, k3, k4 = jax.random.split(key, 4)

    # conv weights ~ N(0, 0.01), as in the module's __init__
    params = {
        "w1": 0.01 * jax.random.normal(k1, (Cinner, Cin, K, K), jnp.float32),
        "w2": 0.01 * jax.random.normal(k2, (Cin, Cinner, K, K), jnp.float32),
        # GroupNorm affine params: PyTorch defaults (weight=1, bias=0)
        "g1w": jnp.ones((Cinner,), jnp.float32),
        "g1b": jnp.zeros((Cinner,), jnp.float32),
        "g2w": jnp.ones((Cin,), jnp.float32),
        "g2b": jnp.zeros((Cin,), jnp.float32),
        "g3w": jnp.ones((Cin,), jnp.float32),
        "g3b": jnp.zeros((Cin,), jnp.float32),
    }

    z = jax.random.normal(k3, (B, Cin, H, W), jnp.float32)
    x = jax.random.normal(k4, (B, Cin, H, W), jnp.float32)

    out = deq_core_forward(z, x, params, num_groups=G)
    out = jax.block_until_ready(out)

    ref = jax.block_until_ready(ref_forward(z, x, params, G))
    max_err = float(jnp.max(jnp.abs(out - ref)))
    assert out.shape == (B, Cin, H, W)
    assert np.isfinite(max_err) and max_err < 1e-3, f"max_err={max_err}"

    print("KERNEL_OK")
</pallas_src>

<mosaic_0001>
module attributes {stable_mosaic.version = 11 : i64} {
  func.func @kernel(%arg0: i32, %arg1: memref<4x256xf32, #tpu.memory_space<vmem>>, %arg2: memref<4x256xf32, #tpu.memory_space<vmem>>, %arg3: memref<9x256xf32, #tpu.memory_space<vmem>>, %arg4: memref<8x72xf32, #tpu.memory_space<vmem>>, %arg5: memref<4x72xf32, #tpu.memory_space<vmem>>, %arg6: memref<8x8xf32, #tpu.memory_space<vmem>>, %arg7: memref<4x4xf32, #tpu.memory_space<vmem>>, %arg8: memref<8x1xf32, #tpu.memory_space<vmem>>, %arg9: memref<8x1xf32, #tpu.memory_space<vmem>>, %arg10: memref<4x1xf32, #tpu.memory_space<vmem>>, %arg11: memref<4x1xf32, #tpu.memory_space<vmem>>, %arg12: memref<4x1xf32, #tpu.memory_space<vmem>>, %arg13: memref<4x1xf32, #tpu.memory_space<vmem>>, %arg14: memref<4x256xf32, #tpu.memory_space<vmem>>, %arg15: memref<72x256xf32, #tpu.memory_space<vmem>>, %arg16: memref<72x256xf32, #tpu.memory_space<vmem>>) attributes {dimension_semantics = [#tpu.dimension_semantics<parallel>], iteration_bounds = array<i64: 2>, scalar_prefetch = 0 : i64, scratch_operands = 2 : i64, tpu.core_type = #tpu.core_type<tc>, window_params = [{transform_indices = @transform_0, window_bounds = array<i64: 4, 256>}, {transform_indices = @transform_1, window_bounds = array<i64: 4, 256>}, {pipeline_mode = #tpu.pipeline_mode<synchronous>, transform_indices = @transform_2, window_bounds = array<i64: 9, 256>}, {pipeline_mode = #tpu.pipeline_mode<synchronous>, transform_indices = @transform_3, window_bounds = array<i64: 8, 72>}, {pipeline_mode = #tpu.pipeline_mode<synchronous>, transform_indices = @transform_4, window_bounds = array<i64: 4, 72>}, {pipeline_mode = #tpu.pipeline_mode<synchronous>, transform_indices = @transform_5, window_bounds = array<i64: 8, 8>}, {pipeline_mode = #tpu.pipeline_mode<synchronous>, transform_indices = @transform_6, window_bounds = array<i64: 4, 4>}, {pipeline_mode = #tpu.pipeline_mode<synchronous>, transform_indices = @transform_7, window_bounds = array<i64: 8, 1>}, {pipeline_mode = #tpu.pipeline_mode<synchronous>, transform_indices = @transform_8, window_bounds = array<i64: 8, 1>}, {pipeline_mode = #tpu.pipeline_mode<synchronous>, transform_indices = @transform_9, window_bounds = array<i64: 4, 1>}, {pipeline_mode = #tpu.pipeline_mode<synchronous>, transform_indices = @transform_10, window_bounds = array<i64: 4, 1>}, {pipeline_mode = #tpu.pipeline_mode<synchronous>, transform_indices = @transform_11, window_bounds = array<i64: 4, 1>}, {pipeline_mode = #tpu.pipeline_mode<synchronous>, transform_indices = @transform_12, window_bounds = array<i64: 4, 1>}, {transform_indices = @transform_13, window_bounds = array<i64: 4, 256>}]} {
    %c0 = arith.constant 0 : index
    %c0_0 = arith.constant 0 : index
    %0 = vector.load %arg1[%c0, %c0_0] : memref<4x256xf32, #tpu.memory_space<vmem>>, vector<4x256xf32>
    %c0_1 = arith.constant 0 : index
    %c0_2 = arith.constant 0 : index
    %1 = vector.load %arg2[%c0_1, %c0_2] : memref<4x256xf32, #tpu.memory_space<vmem>>, vector<4x256xf32>
    %c0_3 = arith.constant 0 : index
    %c0_4 = arith.constant 0 : index
    %2 = vector.load %arg3[%c0_3, %c0_4] : memref<9x256xf32, #tpu.memory_space<vmem>>, vector<9x256xf32>
    %c0_5 = arith.constant 0 : index
    %c0_6 = arith.constant 0 : index
    %3 = vector.load %arg4[%c0_5, %c0_6] : memref<8x72xf32, #tpu.memory_space<vmem>>, vector<8x72xf32>
    %c0_7 = arith.constant 0 : index
    %c0_8 = arith.constant 0 : index
    %4 = vector.load %arg5[%c0_7, %c0_8] : memref<4x72xf32, #tpu.memory_space<vmem>>, vector<4x72xf32>
    %c0_9 = arith.constant 0 : index
    %c0_10 = arith.constant 0 : index
    %5 = vector.load %arg6[%c0_9, %c0_10] : memref<8x8xf32, #tpu.memory_space<vmem>>, vector<8x8xf32>
    %c0_11 = arith.constant 0 : index
    %c0_12 = arith.constant 0 : index
    %6 = vector.load %arg7[%c0_11, %c0_12] : memref<4x4xf32, #tpu.memory_space<vmem>>, vector<4x4xf32>
    %c0_13 = arith.constant 0 : index
    %c0_14 = arith.constant 0 : index
    %7 = vector.load %arg8[%c0_13, %c0_14] : memref<8x1xf32, #tpu.memory_space<vmem>>, vector<8x1xf32>
    %c0_15 = arith.constant 0 : index
    %c0_16 = arith.constant 0 : index
    %8 = vector.load %arg9[%c0_15, %c0_16] : memref<8x1xf32, #tpu.memory_space<vmem>>, vector<8x1xf32>
    %c0_17 = arith.constant 0 : index
    %c0_18 = arith.constant 0 : index
    %9 = vector.load %arg10[%c0_17, %c0_18] : memref<4x1xf32, #tpu.memory_space<vmem>>, vector<4x1xf32>
    %c0_19 = arith.constant 0 : index
    %c0_20 = arith.constant 0 : index
    %10 = vector.load %arg11[%c0_19, %c0_20] : memref<4x1xf32, #tpu.memory_space<vmem>>, vector<4x1xf32>
    %c0_21 = arith.constant 0 : index
    %c0_22 = arith.constant 0 : index
    %11 = vector.load %arg12[%c0_21, %c0_22] : memref<4x1xf32, #tpu.memory_space<vmem>>, vector<4x1xf32>
    %c0_23 = arith.constant 0 : index
    %c0_24 = arith.constant 0 : index
    %12 = vector.load %arg13[%c0_23, %c0_24] : memref<4x1xf32, #tpu.memory_space<vmem>>, vector<4x1xf32>
    %cst = arith.constant 0.000000e+00 : f32
    %13 = vector.broadcast %cst : f32 to vector<4x256xf32>
    %14 = tpu.concatenate %0, %13 in 0 : vector<4x256xf32>, vector<4x256xf32> -> vector<8x256xf32>
    %c17_i32 = arith.constant 17 : i32
    %15 = tpu.dynamic_rotate %14 by %c17_i32 dim 1 : vector<8x256xf32>, i32 -> vector<8x256xf32>
    %16 = vector.extract_strided_slice %2 {offsets = [0, 0], sizes = [1, 256], strides = [1, 1]} : vector<9x256xf32> to vector<1x256xf32>
    %17 = vector.broadcast %16 : vector<1x256xf32> to vector<8x256xf32>
    %18 = arith.mulf %15, %17 : vector<8x256xf32>
    %c0_25 = arith.constant 0 : index
    %c0_26 = arith.constant 0 : index
    %19 = vector.load %arg15[%c0_25, %c0_26] : memref<72x256xf32, #tpu.memory_space<vmem>>, vector<8x256xf32>
    tpu.vector_store %arg15[%c0_25, %c0_26], %18 {strides = array<i32>} : memref<72x256xf32, #tpu.memory_space<vmem>>, vector<8x256xf32>,
    %c16_i32 = arith.constant 16 : i32
    %20 = tpu.dynamic_rotate %14 by %c16_i32 dim 1 : vector<8x256xf32>, i32 -> vector<8x256xf32>
    %21 = vector.extract_strided_slice %2 {offsets = [1, 0], sizes = [1, 256], strides = [1, 1]} : vector<9x256xf32> to vector<1x256xf32>
    %22 = vector.broadcast %21 : vector<1x256xf32> to vector<8x256xf32>
    %23 = arith.mulf %20, %22 : vector<8x256xf32>
    %c8 = arith.constant 8 : index
    %c0_27 = arith.constant 0 : index
    %24 = vector.load %arg15[%c8, %c0_27] : memref<72x256xf32, #tpu.memory_space<vmem>>, vector<8x256xf32>
    tpu.vector_store %arg15[%c8, %c0_27], %23 {strides = array<i32>} : memref<72x256xf32, #tpu.memory_space<vmem>>, vector<8x256xf32>,
    %c15_i32 = arith.constant 15 : i32
    %25 = tpu.dynamic_rotate %14 by %c15_i32 dim 1 : vector<8x256xf32>, i32 -> vector<8x256xf32>
    %26 = vector.extract_strided_slice %2 {offsets = [2, 0], sizes = [1, 256], strides = [1, 1]} : vector<9x256xf32> to vector<1x256xf32>
    %27 = vector.broadcast %26 : vector<1x256xf32> to vector<8x256xf32>
    %28 = arith.mulf %25, %27 : vector<8x256xf32>
    %c16 = arith.constant 16 : index
    %c0_28 = arith.constant 0 : index
    %29 = vector.load %arg15[%c16, %c0_28] : memref<72x256xf32, #tpu.memory_space<vmem>>, vector<8x256xf32>
    tpu.vector_store %arg15[%c16, %c0_28], %28 {strides = array<i32>} : memref<72x256xf32, #tpu.memory_space<vmem>>, vector<8x256xf32>,
    %c1_i32 = arith.constant 1 : i32
    %30 = tpu.dynamic_rotate %14 by %c1_i32 dim 1 : vector<8x256xf32>, i32 -> vector<8x256xf32>
    %31 = vector.extract_strided_slice %2 {offsets = [3, 0], sizes = [1, 256], strides = [1, 1]} : vector<9x256xf32> to vector<1x256xf32>
    %32 = vector.broadcast %31 : vector<1x256xf32> to vector<8x256xf32>
    %33 = arith.mulf %30, %32 : vector<8x256xf32>
    %c24 = arith.constant 24 : index
    %c0_29 = arith.constant 0 : index
    %34 = vector.load %arg15[%c24, %c0_29] : memref<72x256xf32, #tpu.memory_space<vmem>>, vector<8x256xf32>
    tpu.vector_store %arg15[%c24, %c0_29], %33 {strides = array<i32>} : memref<72x256xf32, #tpu.memory_space<vmem>>, vector<8x256xf32>,
    %c32 = arith.constant 32 : index
    %c0_30 = arith.constant 0 : index
    %35 = vector.load %arg15[%c32, %c0_30] : memref<72x256xf32, #tpu.memory_space<vmem>>, vector<8x256xf32>
    tpu.vector_store %arg15[%c32, %c0_30], %14 {strides = array<i32>} : memref<72x256xf32, #tpu.memory_space<vmem>>, vector<8x256xf32>,
    %c255_i32 = arith.constant 255 : i32
    %36 = tpu.dynamic_rotate %14 by %c255_i32 dim 1 : vector<8x256xf32>, i32 -> vector<8x256xf32>
    %37 = vector.extract_strided_slice %2 {offsets = [5, 0], sizes = [1, 256], strides = [1, 1]} : vector<9x256xf32> to vector<1x256xf32>
    %38 = vector.broadcast %37 : vector<1x256xf32> to vector<8x256xf32>
    %39 = arith.mulf %36, %38 : vector<8x256xf32>
    %c40 = arith.constant 40 : index
    %c0_31 = arith.constant 0 : index
    %40 = vector.load %arg15[%c40, %c0_31] : memref<72x256xf32, #tpu.memory_space<vmem>>, vector<8x256xf32>
    tpu.vector_store %arg15[%c40, %c0_31], %39 {strides = array<i32>} : memref<72x256xf32, #tpu.memory_space<vmem>>, vector<8x256xf32>,
    %c241_i32 = arith.constant 241 : i32
    %41 = tpu.dynamic_rotate %14 by %c241_i32 dim 1 : vector<8x256xf32>, i32 -> vector<8x256xf32>
    %42 = vector.extract_strided_slice %2 {offsets = [6, 0], sizes = [1, 256], strides = [1, 1]} : vector<9x256xf32> to vector<1x256xf32>
    %43 = vector.broadcast %42 : vector<1x256xf32> to vector<8x256xf32>
    %44 = arith.mulf %41, %43 : vector<8x256xf32>
    %c48 = arith.constant 48 : index
    %c0_32 = arith.constant 0 : index
    %45 = vector.load %arg15[%c48, %c0_32] : memref<72x256xf32, #tpu.memory_space<vmem>>, vector<8x256xf32>
    tpu.vector_store %arg15[%c48, %c0_32], %44 {strides = array<i32>} : memref<72x256xf32, #tpu.memory_space<vmem>>, vector<8x256xf32>,
    %c240_i32 = arith.constant 240 : i32
    %46 = tpu.dynamic_rotate %14 by %c240_i32 dim 1 : vector<8x256xf32>, i32 -> vector<8x256xf32>
    %47 = vector.extract_strided_slice %2 {offsets = [7, 0], sizes = [1, 256], strides = [1, 1]} : vector<9x256xf32> to vector<1x256xf32>
    %48 = vector.broadcast %47 : vector<1x256xf32> to vector<8x256xf32>
    %49 = arith.mulf %46, %48 : vector<8x256xf32>
    %c56 = arith.constant 56 : index
    %c0_33 = arith.constant 0 : index
    %50 = vector.load %arg15[%c56, %c0_33] : memref<72x256xf32, #tpu.memory_space<vmem>>, vector<8x256xf32>
    tpu.vector_store %arg15[%c56, %c0_33], %49 {strides = array<i32>} : memref<72x256xf32, #tpu.memory_space<vmem>>, vector<8x256xf32>,
    %c239_i32 = arith.constant 239 : i32
    %51 = tpu.dynamic_rotate %14 by %c239_i32 dim 1 : vector<8x256xf32>, i32 -> vector<8x256xf32>
    %52 = vector.extract_strided_slice %2 {offsets = [8, 0], sizes = [1, 256], strides = [1, 1]} : vector<9x256xf32> to vector<1x256xf32>
    %53 = vector.broadcast %52 : vector<1x256xf32> to vector<8x256xf32>
    %54 = arith.mulf %51, %53 : vector<8x256xf32>
    %c64 = arith.constant 64 : index
    %c0_34 = arith.constant 0 : index
    %55 = vector.load %arg15[%c64, %c0_34] : memref<72x256xf32, #tpu.memory_space<vmem>>, vector<8x256xf32>
    tpu.vector_store %arg15[%c64, %c0_34], %54 {strides = array<i32>} : memref<72x256xf32, #tpu.memory_space<vmem>>, vector<8x256xf32>,
    %c0_35 = arith.constant 0 : index
    %c0_36 = arith.constant 0 : index
    %56 = vector.load %arg15[%c0_35, %c0_36] : memref<72x256xf32, #tpu.memory_space<vmem>>, vector<72x256xf32>
    %cst_37 = arith.constant dense<0.000000e+00> : vector<8x256xf32>
    %57 = tpu.matmul %3, %56, %cst_37 {dimension_numbers = #tpu.dot_dimension_numbers<[1], [0], [0], [1], [0, 0, 1, 1], [], []>} : vector<8x72xf32>, vector<72x256xf32>, vector<8x256xf32> -> vector<8x256xf32>
    %cst_38 = arith.constant 0.000000e+00 : f32
    %58 = vector.broadcast %cst_38 : f32 to vector<8x256xf32>
    %59 = arith.maximumf %57, %58 : vector<8x256xf32>
    %cst_39 = arith.constant dense<0.000000e+00> : vector<8xf32>
    %60 = vector.multi_reduction <add>, %59, %cst_39 [1] : vector<8x256xf32> to vector<8xf32>
    %61 = vector.shape_cast %60 : vector<8xf32> to vector<8x1xf32>
    %62 = arith.mulf %59, %59 : vector<8x256xf32>
    %cst_40 = arith.constant dense<0.000000e+00> : vector<8xf32>
    %63 = vector.multi_reduction <add>, %62, %cst_40 [1] : vector<8x256xf32> to vector<8xf32>
    %64 = vector.shape_cast %63 : vector<8xf32> to vector<8x1xf32>
    %cst_41 = arith.constant dense<0.000000e+00> : vector<8x1xf32>
    %65 = tpu.matmul %5, %61, %cst_41 {dimension_numbers = #tpu.dot_dimension_numbers<[1], [0], [0], [1], [0, 0, 1, 1], [], []>} : vector<8x8xf32>, vector<8x1xf32>, vector<8x1xf32> -> vector<8x1xf32>
    %cst_42 = arith.constant dense<0.000000e+00> : vector<8x1xf32>
    %66 = tpu.matmul %5, %64, %cst_42 {dimension_numbers = #tpu.dot_dimension_numbers<[1], [0], [0], [1], [0, 0, 1, 1], [], []>} : vector<8x8xf32>, vector<8x1xf32>, vector<8x1xf32> -> vector<8x1xf32>
    %67 = arith.mulf %65, %65 : vector<8x1xf32>
    %68 = arith.subf %66, %67 : vector<8x1xf32>
    %cst_43 = arith.constant 0.000000e+00 : f32
    %69 = vector.broadcast %cst_43 : f32 to vector<8x1xf32>
    %70 = arith.maximumf %68, %69 : vector<8x1xf32>
    %cst_44 = arith.constant 9.99999974E-6 : f32
    %71 = vector.broadcast %cst_44 : f32 to vector<8x1xf32>
    %72 = arith.addf %70, %71 : vector<8x1xf32>
    %73 = math.rsqrt %72 : vector<8x1xf32>
    %74 = vector.broadcast %65 : vector<8x1xf32> to vector<8x256xf32>
    %75 = arith.subf %59, %74 : vector<8x256xf32>
    %76 = vector.broadcast %73 : vector<8x1xf32> to vector<8x256xf32>
    %77 = arith.mulf %75, %76 : vector<8x256xf32>
    %78 = vector.broadcast %7 : vector<8x1xf32> to vector<8x256xf32>
    %79 = arith.mulf %77, %78 : vector<8x256xf32>
    %80 = vector.broadcast %8 : vector<8x1xf32> to vector<8x256xf32>
    %81 = arith.addf %79, %80 : vector<8x256xf32>
    %c17_i32_45 = arith.constant 17 : i32
    %82 = tpu.dynamic_rotate %81 by %c17_i32_45 dim 1 : vector<8x256xf32>, i32 -> vector<8x256xf32>
    %83 = vector.extract_strided_slice %2 {offsets = [0, 0], sizes = [1, 256], strides = [1, 1]} : vector<9x256xf32> to vector<1x256xf32>
    %84 = vector.broadcast %83 : vector<1x256xf32> to vector<8x256xf32>
    %85 = arith.mulf %82, %84 : vector<8x256xf32>
    %c0_46 = arith.constant 0 : index
    %c0_47 = arith.constant 0 : index
    %86 = vector.load %arg16[%c0_46, %c0_47] : memref<72x256xf32, #tpu.memory_space<vmem>>, vector<8x256xf32>
    tpu.vector_store %arg16[%c0_46, %c0_47], %85 {strides = array<i32>} : memref<72x256xf32, #tpu.memory_space<vmem>>, vector<8x256xf32>,
    %c16_i32_48 = arith.constant 16 : i32
    %87 = tpu.dynamic_rotate %81 by %c16_i32_48 dim 1 : vector<8x256xf32>, i32 -> vector<8x256xf32>
    %88 = vector.extract_strided_slice %2 {offsets = [1, 0], sizes = [1, 256], strides = [1, 1]} : vector<9x256xf32> to vector<1x256xf32>
    %89 = vector.broadcast %88 : vector<1x256xf32> to vector<8x256xf32>
    %90 = arith.mulf %87, %89 : vector<8x256xf32>
    %c8_49 = arith.constant 8 : index
    %c0_50 = arith.constant 0 : index
    %91 = vector.load %arg16[%c8_49, %c0_50] : memref<72x256xf32, #tpu.memory_space<vmem>>, vector<8x256xf32>
    tpu.vector_store %arg16[%c8_49, %c0_50], %90 {strides = array<i32>} : memref<72x256xf32, #tpu.memory_space<vmem>>, vector<8x256xf32>,
    %c15_i32_51 = arith.constant 15 : i32
    %92 = tpu.dynamic_rotate %81 by %c15_i32_51 dim 1 : vector<8x256xf32>, i32 -> vector<8x256xf32>
    %93 = vector.extract_strided_slice %2 {offsets = [2, 0], sizes = [1, 256], strides = [1, 1]} : vector<9x256xf32> to vector<1x256xf32>
    %94 = vector.broadcast %93 : vector<1x256xf32> to vector<8x256xf32>
    %95 = arith.mulf %92, %94 : vector<8x256xf32>
    %c16_52 = arith.constant 16 : index
    %c0_53 = arith.constant 0 : index
    %96 = vector.load %arg16[%c16_52, %c0_53] : memref<72x256xf32, #tpu.memory_space<vmem>>, vector<8x256xf32>
    tpu.vector_store %arg16[%c16_52, %c0_53], %95 {strides = array<i32>} : memref<72x256xf32, #tpu.memory_space<vmem>>, vector<8x256xf32>,
    %c1_i32_54 = arith.constant 1 : i32
    %97 = tpu.dynamic_rotate %81 by %c1_i32_54 dim 1 : vector<8x256xf32>, i32 -> vector<8x256xf32>
    %98 = vector.extract_strided_slice %2 {offsets = [3, 0], sizes = [1, 256], strides = [1, 1]} : vector<9x256xf32> to vector<1x256xf32>
    %99 = vector.broadcast %98 : vector<1x256xf32> to vector<8x256xf32>
    %100 = arith.mulf %97, %99 : vector<8x256xf32>
    %c24_55 = arith.constant 24 : index
    %c0_56 = arith.constant 0 : index
    %101 = vector.load %arg16[%c24_55, %c0_56] : memref<72x256xf32, #tpu.memory_space<vmem>>, vector<8x256xf32>
    tpu.vector_store %arg16[%c24_55, %c0_56], %100 {strides = array<i32>} : memref<72x256xf32, #tpu.memory_space<vmem>>, vector<8x256xf32>,
    %c32_57 = arith.constant 32 : index
    %c0_58 = arith.constant 0 : index
    %102 = vector.load %arg16[%c32_57, %c0_58] : memref<72x256xf32, #tpu.memory_space<vmem>>, vector<8x256xf32>
    tpu.vector_store %arg16[%c32_57, %c0_58], %81 {strides = array<i32>} : memref<72x256xf32, #tpu.memory_space<vmem>>, vector<8x256xf32>,
    %c255_i32_59 = arith.constant 255 : i32
    %103 = tpu.dynamic_rotate %81 by %c255_i32_59 dim 1 : vector<8x256xf32>, i32 -> vector<8x256xf32>
    %104 = vector.extract_strided_slice %2 {offsets = [5, 0], sizes = [1, 256], strides = [1, 1]} : vector<9x256xf32> to vector<1x256xf32>
    %105 = vector.broadcast %104 : vector<1x256xf32> to vector<8x256xf32>
    %106 = arith.mulf %103, %105 : vector<8x256xf32>
    %c40_60 = arith.constant 40 : index
    %c0_61 = arith.constant 0 : index
    %107 = vector.load %arg16[%c40_60, %c0_61] : memref<72x256xf32, #tpu.memory_space<vmem>>, vector<8x256xf32>
    tpu.vector_store %arg16[%c40_60, %c0_61], %106 {strides = array<i32>} : memref<72x256xf32, #tpu.memory_space<vmem>>, vector<8x256xf32>,
    %c241_i32_62 = arith.constant 241 : i32
    %108 = tpu.dynamic_rotate %81 by %c241_i32_62 dim 1 : vector<8x256xf32>, i32 -> vector<8x256xf32>
    %109 = vector.extract_strided_slice %2 {offsets = [6, 0], sizes = [1, 256], strides = [1, 1]} : vector<9x256xf32> to vector<1x256xf32>
    %110 = vector.broadcast %109 : vector<1x256xf32> to vector<8x256xf32>
    %111 = arith.mulf %108, %110 : vector<8x256xf32>
    %c48_63 = arith.constant 48 : index
    %c0_64 = arith.constant 0 : index
    %112 = vector.load %arg16[%c48_63, %c0_64] : memref<72x256xf32, #tpu.memory_space<vmem>>, vector<8x256xf32>
    tpu.vector_store %arg16[%c48_63, %c0_64], %111 {strides = array<i32>} : memref<72x256xf32, #tpu.memory_space<vmem>>, vector<8x256xf32>,
    %c240_i32_65 = arith.constant 240 : i32
    %113 = tpu.dynamic_rotate %81 by %c240_i32_65 dim 1 : vector<8x256xf32>, i32 -> vector<8x256xf32>
    %114 = vector.extract_strided_slice %2 {offsets = [7, 0], sizes = [1, 256], strides = [1, 1]} : vector<9x256xf32> to vector<1x256xf32>
    %115 = vector.broadcast %114 : vector<1x256xf32> to vector<8x256xf32>
    %116 = arith.mulf %113, %115 : vector<8x256xf32>
    %c56_66 = arith.constant 56 : index
    %c0_67 = arith.constant 0 : index
    %117 = vector.load %arg16[%c56_66, %c0_67] : memref<72x256xf32, #tpu.memory_space<vmem>>, vector<8x256xf32>
    tpu.vector_store %arg16[%c56_66, %c0_67], %116 {strides = array<i32>} : memref<72x256xf32, #tpu.memory_space<vmem>>, vector<8x256xf32>,
    %c239_i32_68 = arith.constant 239 : i32
    %118 = tpu.dynamic_rotate %81 by %c239_i32_68 dim 1 : vector<8x256xf32>, i32 -> vector<8x256xf32>
    %119 = vector.extract_strided_slice %2 {offsets = [8, 0], sizes = [1, 256], strides = [1, 1]} : vector<9x256xf32> to vector<1x256xf32>
    %120 = vector.broadcast %119 : vector<1x256xf32> to vector<8x256xf32>
    %121 = arith.mulf %118, %120 : vector<8x256xf32>
    %c64_69 = arith.constant 64 : index
    %c0_70 = arith.constant 0 : index
    %122 = vector.load %arg16[%c64_69, %c0_70] : memref<72x256xf32, #tpu.memory_space<vmem>>, vector<8x256xf32>
    tpu.vector_store %arg16[%c64_69, %c0_70], %121 {strides = array<i32>} : memref<72x256xf32, #tpu.memory_space<vmem>>, vector<8x256xf32>,
    %c0_71 = arith.constant 0 : index
    %c0_72 = arith.constant 0 : index
    %123 = vector.load %arg16[%c0_71, %c0_72] : memref<72x256xf32, #tpu.memory_space<vmem>>, vector<72x256xf32>
    %cst_73 = arith.constant dense<0.000000e+00> : vector<4x256xf32>
    %124 = tpu.matmul %4, %123, %cst_73 {dimension_numbers = #tpu.dot_dimension_numbers<[1], [0], [0], [1], [0, 0, 1, 1], [], []>} : vector<4x72xf32>, vector<72x256xf32>, vector<4x256xf32> -> vector<4x256xf32>
    %125 = arith.addf %1, %124 : vector<4x256xf32>
    %cst_74 = arith.constant dense<0.000000e+00> : vector<4xf32>
    %126 = vector.multi_reduction <add>, %125, %cst_74 [1] : vector<4x256xf32> to vector<4xf32>
    %127 = vector.shape_cast %126 : vector<4xf32> to vector<4x1xf32>
    %128 = arith.mulf %125, %125 : vector<4x256xf32>
    %cst_75 = arith.constant dense<0.000000e+00> : vector<4xf32>
    %129 = vector.multi_reduction <add>, %128, %cst_75 [1] : vector<4x256xf32> to vector<4xf32>
    %130 = vector.shape_cast %129 : vector<4xf32> to vector<4x1xf32>
    %cst_76 = arith.constant dense<0.000000e+00> : vector<4x1xf32>
    %131 = tpu.matmul %6, %127, %cst_76 {dimension_numbers = #tpu.dot_dimension_numbers<[1], [0], [0], [1], [0, 0, 1, 1], [], []>} : vector<4x4xf32>, vector<4x1xf32>, vector<4x1xf32> -> vector<4x1xf32>
    %cst_77 = arith.constant dense<0.000000e+00> : vector<4x1xf32>
    %132 = tpu.matmul %6, %130, %cst_77 {dimension_numbers = #tpu.dot_dimension_numbers<[1], [0], [0], [1], [0, 0, 1, 1], [], []>} : vector<4x4xf32>, vector<4x1xf32>, vector<4x1xf32> -> vector<4x1xf32>
    %133 = arith.mulf %131, %131 : vector<4x1xf32>
    %134 = arith.subf %132, %133 : vector<4x1xf32>
    %cst_78 = arith.constant 0.000000e+00 : f32
    %135 = vector.broadcast %cst_78 : f32 to vector<4x1xf32>
    %136 = arith.maximumf %134, %135 : vector<4x1xf32>
    %cst_79 = arith.constant 9.99999974E-6 : f32
    %137 = vector.broadcast %cst_79 : f32 to vector<4x1xf32>
    %138 = arith.addf %136, %137 : vector<4x1xf32>
    %139 = math.rsqrt %138 : vector<4x1xf32>
    %140 = vector.broadcast %131 : vector<4x1xf32> to vector<4x256xf32>
    %141 = arith.subf %125, %140 : vector<4x256xf32>
    %142 = vector.broadcast %139 : vector<4x1xf32> to vector<4x256xf32>
    %143 = arith.mulf %141, %142 : vector<4x256xf32>
    %144 = vector.broadcast %9 : vector<4x1xf32> to vector<4x256xf32>
    %145 = arith.mulf %143, %144 : vector<4x256xf32>
    %146 = vector.broadcast %10 : vector<4x1xf32> to vector<4x256xf32>
    %147 = arith.addf %145, %146 : vector<4x256xf32>
    %148 = arith.addf %0, %147 : vector<4x256xf32>
    %cst_80 = arith.constant 0.000000e+00 : f32
    %149 = vector.broadcast %cst_80 : f32 to vector<4x256xf32>
    %150 = arith.maximumf %148, %149 : vector<4x256xf32>
    %cst_81 = arith.constant dense<0.000000e+00> : vector<4xf32>
    %151 = vector.multi_reduction <add>, %150, %cst_81 [1] : vector<4x256xf32> to vector<4xf32>
    %152 = vector.shape_cast %151 : vector<4xf32> to vector<4x1xf32>
    %153 = arith.mulf %150, %150 : vector<4x256xf32>
    %cst_82 = arith.constant dense<0.000000e+00> : vector<4xf32>
    %154 = vector.multi_reduction <add>, %153, %cst_82 [1] : vector<4x256xf32> to vector<4xf32>
    %155 = vector.shape_cast %154 : vector<4xf32> to vector<4x1xf32>
    %cst_83 = arith.constant dense<0.000000e+00> : vector<4x1xf32>
    %156 = tpu.matmul %6, %152, %cst_83 {dimension_numbers = #tpu.dot_dimension_numbers<[1], [0], [0], [1], [0, 0, 1, 1], [], []>} : vector<4x4xf32>, vector<4x1xf32>, vector<4x1xf32> -> vector<4x1xf32>
    %cst_84 = arith.constant dense<0.000000e+00> : vector<4x1xf32>
    %157 = tpu.matmul %6, %155, %cst_84 {dimension_numbers = #tpu.dot_dimension_numbers<[1], [0], [0], [1], [0, 0, 1, 1], [], []>} : vector<4x4xf32>, vector<4x1xf32>, vector<4x1xf32> -> vector<4x1xf32>
    %158 = arith.mulf %156, %156 : vector<4x1xf32>
    %159 = arith.subf %157, %158 : vector<4x1xf32>
    %cst_85 = arith.constant 0.000000e+00 : f32
    %160 = vector.broadcast %cst_85 : f32 to vector<4x1xf32>
    %161 = arith.maximumf %159, %160 : vector<4x1xf32>
    %cst_86 = arith.constant 9.99999974E-6 : f32
    %162 = vector.broadcast %cst_86 : f32 to vector<4x1xf32>
    %163 = arith.addf %161, %162 : vector<4x1xf32>
    %164 = math.rsqrt %163 : vector<4x1xf32>
    %165 = vector.broadcast %156 : vector<4x1xf32> to vector<4x256xf32>
    %166 = arith.subf %150, %165 : vector<4x256xf32>
    %167 = vector.broadcast %164 : vector<4x1xf32> to vector<4x256xf32>
    %168 = arith.mulf %166, %167 : vector<4x256xf32>
    %169 = vector.broadcast %11 : vector<4x1xf32> to vector<4x256xf32>
    %170 = arith.mulf %168, %169 : vector<4x256xf32>
    %171 = vector.broadcast %12 : vector<4x1xf32> to vector<4x256xf32>
    %172 = arith.addf %170, %171 : vector<4x256xf32>
    %c0_87 = arith.constant 0 : index
    %c0_88 = arith.constant 0 : index
    %173 = vector.load %arg14[%c0_87, %c0_88] : memref<4x256xf32, #tpu.memory_space<vmem>>, vector<4x256xf32>
    tpu.vector_store %arg14[%c0_87, %c0_88], %172 {strides = array<i32>} : memref<4x256xf32, #tpu.memory_space<vmem>>, vector<4x256xf32>,
    return
  }
  func.func @transform_0(%arg0: i32) -> (i32, i32) {
    %c0_i32 = arith.constant 0 : i32
    %c0_i32_0 = arith.constant 0 : i32
    return %c0_i32, %arg0 : i32, i32
  }
  func.func @transform_1(%arg0: i32) -> (i32, i32) {
    %c0_i32 = arith.constant 0 : i32
    %c0_i32_0 = arith.constant 0 : i32
    return %c0_i32, %arg0 : i32, i32
  }
  func.func @transform_2(%arg0: i32) -> (i32, i32) {
    %c0_i32 = arith.constant 0 : i32
    %c0_i32_0 = arith.constant 0 : i32
    %c0_i32_1 = arith.constant 0 : i32
    return %c0_i32, %c0_i32_0 : i32, i32
  }
  func.func @transform_3(%arg0: i32) -> (i32, i32) {
    %c0_i32 = arith.constant 0 : i32
    %c0_i32_0 = arith.constant 0 : i32
    %c0_i32_1 = arith.constant 0 : i32
    return %c0_i32, %c0_i32_0 : i32, i32
  }
  func.func @transform_4(%arg0: i32) -> (i32, i32) {
    %c0_i32 = arith.constant 0 : i32
    %c0_i32_0 = arith.constant 0 : i32
    %c0_i32_1 = arith.constant 0 : i32
    return %c0_i32, %c0_i32_0 : i32, i32
  }
  func.func @transform_5(%arg0: i32) -> (i32, i32) {
    %c0_i32 = arith.constant 0 : i32
    %c0_i32_0 = arith.constant 0 : i32
    %c0_i32_1 = arith.constant 0 : i32
    return %c0_i32, %c0_i32_0 : i32, i32
  }
  func.func @transform_6(%arg0: i32) -> (i32, i32) {
    %c0_i32 = arith.constant 0 : i32
    %c0_i32_0 = arith.constant 0 : i32
    %c0_i32_1 = arith.constant 0 : i32
    return %c0_i32, %c0_i32_0 : i32, i32
  }
  func.func @transform_7(%arg0: i32) -> (i32, i32) {
    %c0_i32 = arith.constant 0 : i32
    %c0_i32_0 = arith.constant 0 : i32
    %c0_i32_1 = arith.constant 0 : i32
    return %c0_i32, %c0_i32_0 : i32, i32
  }
  func.func @transform_8(%arg0: i32) -> (i32, i32) {
    %c0_i32 = arith.constant 0 : i32
    %c0_i32_0 = arith.constant 0 : i32
    %c0_i32_1 = arith.constant 0 : i32
    return %c0_i32, %c0_i32_0 : i32, i32
  }
  func.func @transform_9(%arg0: i32) -> (i32, i32) {
    %c0_i32 = arith.constant 0 : i32
    %c0_i32_0 = arith.constant 0 : i32
    %c0_i32_1 = arith.constant 0 : i32
    return %c0_i32, %c0_i32_0 : i32, i32
  }
  func.func @transform_10(%arg0: i32) -> (i32, i32) {
    %c0_i32 = arith.constant 0 : i32
    %c0_i32_0 = arith.constant 0 : i32
    %c0_i32_1 = arith.constant 0 : i32
    return %c0_i32, %c0_i32_0 : i32, i32
  }
  func.func @transform_11(%arg0: i32) -> (i32, i32) {
    %c0_i32 = arith.constant 0 : i32
    %c0_i32_0 = arith.constant 0 : i32
    %c0_i32_1 = arith.constant 0 : i32
    return %c0_i32, %c0_i32_0 : i32, i32
  }
  func.func @transform_12(%arg0: i32) -> (i32, i32) {
    %c0_i32 = arith.constant 0 : i32
    %c0_i32_0 = arith.constant 0 : i32
    %c0_i32_1 = arith.constant 0 : i32
    return %c0_i32, %c0_i32_0 : i32, i32
  }
  func.func @transform_13(%arg0: i32) -> (i32, i32) {
    %c0_i32 = arith.constant 0 : i32
    %c0_i32_0 = arith.constant 0 : i32
    return %c0_i32, %arg0 : i32, i32
  }
}

</mosaic_0001>

<bundles_post_ra>
// kernel: deq_core_forward.1
= control target key start
LH: loop header
LB: loop body
LE: loop exit
PB: predicated region body
PF: predicated region fallthrough
CT: control target
= control target key end

     0   :  { %s1844_s25 = smov 0   ;;  %s2172_s0 = inlined_call_operand.vmem [shape: f32[4,512], index: 0, kind: input, shape index: {}]   ;;  %s2173_s1 = inlined_call_operand.vmem [shape: f32[4,512], index: 1, kind: input, shape index: {}]   ;;  %s2174_s2 = inlined_call_operand.vmem [shape: f32[9,256], index: 2, kind: input, shape index: {}]   ;;  %s2175_s3 = inlined_call_operand.vmem [shape: f32[8,72], index: 3, kind: input, shape index: {}]   ;;  %s2176_s4 = inlined_call_operand.vmem [shape: f32[4,72], index: 4, kind: input, shape index: {}]   ;;  %s2177_s5 = inlined_call_operand.vmem [shape: f32[8,8], index: 5, kind: input, shape index: {}]   ;;  %s2178_s6 = inlined_call_operand.vmem [shape: f32[4,4], index: 6, kind: input, shape index: {}]   ;;  %s2179_s7 = inlined_call_operand.vmem [shape: f32[8,1], index: 7, kind: input, shape index: {}]   ;;  %s2180_s8 = inlined_call_operand.vmem [shape: f32[8,1], index: 8, kind: input, shape index: {}]   ;;  %s2181_s9 = inlined_call_operand.vmem [shape: f32[4,1], index: 9, kind: input, shape index: {}]   ;;  %s2182_s10 = inlined_call_operand.vmem [shape: f32[4,1], index: 10, kind: input, shape index: {}]   ;;  %s2183_s11 = inlined_call_operand.vmem [shape: f32[4,1], index: 11, kind: input, shape index: {}]   ;;  %s2184_s12 = inlined_call_operand.vmem [shape: f32[4,1], index: 12, kind: input, shape index: {}]   ;;  %s2185_s13 = inlined_call_operand.vmem [shape: f32[4,512], index: 13, kind: output, shape index: {}]  }
   0x1 LB: > { %s1618_s26 = sadd.s32 4294967295, %s1759_s25   ;;  %p1622_p0 = scmp.ge.s32.totalorder %s1759_s25, 1  ;;  %s1759_s25 = sphi %s1844_s25, %s23_s25  }
   0x2   : > { %p399_p1 = scmp.lt.s32.totalorder %s1759_s25, 3 }
   0x4   : > { %p400_p2 = pnand %p1622_p0, %p399_p1 }
   0x5   : > { %s1623_s27 = sshll.u32 (!%p400_p2), %s1618_s26, 1  ;;  %vm485_vm0 = vcmask (!%p400_p2), 1043456   ;;  %s1761_s15 = smov (!%p400_p2), 16   ;;  %v1767_v4 = vmov (!%p400_p2), 0.0   ;;  %v492_v5 = vlaneseq (!%p400_p2)  ;;  %v1895_v12 = vld [vmem:[%s2174_s2] sm:$0xff] (!%p400_p2)  ;;  %v1900_v13 = vld [vmem:[%s2174_s2 + $0x8] sm:$0xff] (!%p400_p2) }
   0x6   : > { %403 = sbr.rel (%p400_p2) target bundleno = 2307 (0x903), region = 72  ;;  %p449_p3 = scmp.lt.s32.totalorder (!%p400_p2), %s1623_s27, 3  ;;  %730 = vmatprep.mubr.f32.mxu0 (!%p400_p2), %v1767_v4  ;;  %1659 = vmatprep.subr.mxu1 (!%p400_p2), %v1767_v4  ;;  %vm1770_vm6 = vmmov (!%p400_p2), 1   ;;  %vm662_vm11 = vcmask (!%p400_p2), 588800   ;;  %vm1771_vm12 = vmmov (!%p400_p2), 0   ;;  %vm747_vm13 = vcmask (!%p400_p2), 64512  }
   0x7   : > { %s1762_s16 = smov (!%p400_p2), 17   ;;  %s1763_s17 = smov (!%p400_p2), 15   ;;  %v1886_v6 = vshrl.u32 (!%p400_p2), %v492_v5, 7  ;;  %v1888_v9 = vand.u32 (!%p400_p2), 127, %v492_v5  ;;  %vm1698_vm7 = vmpackc.low (!%p400_p2), %vm1770_vm6, %vm485_vm0  ;;  %1661 = vmatprep.mubr.msk.f32.mxu1 (!%p400_p2), %vm1771_vm12, %v1767_v4  ;;  %vm1120_vm14 = vcmask (!%p400_p2), 31744  }
   0x8   : > { %s1764_s18 = smov (!%p400_p2), 1   ;;  %s1765_s19 = smov (!%p400_p2), 127  }
   0x9   : > { %s1766_s20 = smov (!%p400_p2), 113   ;;  %s1768_s21 = smov (!%p400_p2), 112   ;;  %v518_v10 = vsub.s32 (!%p400_p2), 1, %v1886_v6  ;;  %v499_v11 = vsub.s32 (!%p400_p2), 0, %v1886_v6  ;;  %vm513_vm1 = vcmp.lt.s32.totalorder (!%p400_p2), %v1888_v9, 16  ;;  %v537_v16 = vsub.s32 (!%p400_p2), 2, %v1886_v6 }
   0xa   : > { %s1769_s22 = smov (!%p400_p2), 111   ;;  %v556_v17 = vsub.s32 (!%p400_p2), 3, %v1886_v6  ;;  %vm494_vm2 = vcmp.lt.s32.totalorder (!%p400_p2), %v1888_v9, 17  ;;  %vm532_vm3 = vcmp.lt.s32.totalorder (!%p400_p2), %v1888_v9, 15  ;;  %vm551_vm4 = vcmp.lt.s32.totalorder (!%p400_p2), %v1888_v9, 1 }
   0xb   : > { %v1907_v18 = vrot.slane (!%p400_p2), %v1895_v12, %v518_v10  ;;  %v1910_v19 = vrot.slane (!%p400_p2), %v1895_v12, %v499_v11  ;;  %v1913_v20 = vrot.slane (!%p400_p2), %v1900_v13, %v499_v11  ;;  %v1916_v21 = vrot.slane (!%p400_p2), %v1900_v13, %v518_v10 }
   0xc   : > { %v1924_v24 = vrot.slane (!%p400_p2), %v1895_v12, %v537_v16  ;;  %v1927_v25 = vrot.slane (!%p400_p2), %v1900_v13, %v537_v16  ;;  %v1931_v28 = vrot.slane (!%p400_p2), %v1895_v12, %v556_v17  ;;  %v1938_v31 = vrot.slane (!%p400_p2), %v1900_v13, %v556_v17 }
   0xd   : > { %s2187_s27 = smov (!%p449_p3, %s1623_s27), 3  ;;  %v577_v32 = vsub.s32 5, %v1886_v6  ;;  %vm572_vm5 = vcmp.lt.s32.totalorder %v1888_v9, 127  ;;  %v596_v57 = vsub.s32 6, %v1886_v6  ;;  %v615_v60 = vsub.s32 7, %v1886_v6 }
   0xe   : > { %s1852_s28 = sshll.u32 %s2187_s27, 2  ;;  %vm591_vm8 = vcmp.lt.s32.totalorder %v1888_v9, 113  ;;  %vm610_vm9 = vcmp.lt.s32.totalorder %v1888_v9, 112  ;;  %vm629_vm10 = vcmp.lt.s32.totalorder %v1888_v9, 111 }
   0xf   : > { %s452_s14 = scalar_lea.vmem %s2172_s0, %s1852_s28  ;;  %v1955_v45 = vrot.slane %v1895_v12, %v577_v32  ;;  %v1958_v46 = vrot.slane %v1900_v13, %v577_v32  ;;  %v1980_v5 = vrot.slane %v1900_v13, %v596_v57 }
  0x10   : > { %v1858_v0 = vld [vmem:[%s452_s14] sm:$0xff] }
  0x11   : > { %v486_v1 = vsel %vm485_vm0, %v1858_v0, 0.0  ;;  %v1864_v2 = vcombine.high %v1858_v0, %v1858_v0 }
  0x12   : > { %509 = vrot.lane.b32.xlu1 %v486_v1, %s1761_s15  ;;  %488 = vrot.lane.b32.xlu0 %v486_v1, %s1762_s16 }
  0x13   : > { %v487_v3 = vsel %vm485_vm0, %v1864_v2, 0.0 }
  0x16   : > { %528 = vrot.lane.b32.xlu0 %v486_v1, %s1763_s17  ;;  %511 = vrot.lane.b32.xlu1 %v487_v3, %s1761_s15 }
  0x1a   : > { %530 = vrot.lane.b32.xlu1 %v487_v3, %s1763_s17  ;;  %490 = vrot.lane.b32.xlu0 %v487_v3, %s1762_s16 }
  0x1e   : > { %549 = vrot.lane.b32.xlu1 %v487_v3, %s1764_s18  ;;  %547 = vrot.lane.b32.xlu0 %v486_v1, %s1764_s18 }
  0x22   : > { %570 = vrot.lane.b32.xlu1 %v487_v3, %s1765_s19  ;;  %568 = vrot.lane.b32.xlu0 %v486_v1, %s1765_s19 }
  0x26   : > { %589 = vrot.lane.b32.xlu1 %v487_v3, %s1766_s20  ;;  %587 = vrot.lane.b32.xlu0 %v486_v1, %s1766_s20 }
  0x2a   : > { %608 = vrot.lane.b32.xlu1 %v487_v3, %s1768_s21  ;;  %606 = vrot.lane.b32.xlu0 %v486_v1, %s1768_s21 }
  0x2e   : > { %627 = vrot.lane.b32.xlu1 %v487_v3, %s1769_s22  ;;  %625 = vrot.lane.b32.xlu0 %v486_v1, %s1769_s22  ;;  %v1977_v3 = vrot.slane %v1895_v12, %v596_v57 }
  0x84   : > { %v510_v7 = vpop.permute.xlu1 %509  ;;  %v489_v8 = vpop.permute.xlu0 %488 }
  0x88   : > { %v529_v14 = vpop.permute.xlu0 %528  ;;  %v512_v15 = vpop.permute.xlu1 %511 }
  0x89   : > { %v514_v22 = vsel %vm513_vm1, %v510_v7, %v512_v15  ;;  %v515_v23 = vsel %vm513_vm1, %v512_v15, %v510_v7  ;;  %v1984_v7 = vrot.slane %v1895_v12, %v615_v60 }
  0x8a   : > { %v524_v33 = vmul.f32 %v1907_v18, %v515_v23  ;;  %v525_v36 = vmul.f32 %v1916_v21, %v514_v22  ;;  %v2005_v23 = vld [vmem:[%s2174_s2 + $0x18] ss:$0 sm:$0xff] }
  0x8c   : > { %v531_v26 = vpop.permute.xlu1 %530  ;;  %v491_v27 = vpop.permute.xlu0 %490 }
  0x8d   : > { %v495_v29 = vsel %vm494_vm2, %v489_v8, %v491_v27  ;;  %v496_v30 = vsel %vm494_vm2, %v491_v27, %v489_v8  ;;  %v533_v37 = vsel %vm532_vm3, %v529_v14, %v531_v26  ;;  %v534_v38 = vsel %vm532_vm3, %v531_v26, %v529_v14 }
  0x8e   : > { %v505_v34 = vmul.f32 %v1910_v19, %v496_v30  ;;  %v506_v35 = vmul.f32 %v1913_v20, %v495_v29  ;;  %v543_v47 = vmul.f32 %v1924_v24, %v534_v38  ;;  %v544_v48 = vmul.f32 %v1927_v25, %v533_v37  ;;  %v2010_v29 = vld [vmem:[%s2174_s2 + $0x10] ss:$0 sm:$0xff]  ;;  %v472_v37 = vld [vmem:[%s2175_s3] sm:$0xff] }
  0x90   : > { %v550_v39 = vpop.permute.xlu1 %549  ;;  %v548_v40 = vpop.permute.xlu0 %547  ;;  %v1689_v41 = vpack.c.bf16 %v525_v36, %v506_v35  ;;  %v1691_v42 = vpack.c.bf16 %v524_v33, %v505_v34 }
  0x91   : > { %v552_v43 = vsel %vm551_vm4, %v548_v40, %v550_v39  ;;  %v553_v44 = vsel %vm551_vm4, %v550_v39, %v548_v40 }
  0x92   : > { %v562_v49 = vmul.f32 %v1931_v28, %v553_v44  ;;  %v563_v50 = vmul.f32 %v1938_v31, %v552_v43  ;;  %1690 = vmatprep.subr.bf16.mxu0 %v1689_v41 }
  0x93   : > { %1692 = vmatpush1.bf16.msra.mxu0 %v1691_v42 }
  0x94   : > { %v571_v51 = vpop.permute.xlu1 %570  ;;  %v569_v52 = vpop.permute.xlu0 %568  ;;  %v1693_v53 = vpack.c.bf16 %v563_v50, %v544_v48  ;;  %v1695_v54 = vpack.c.bf16 %v562_v49, %v543_v47  ;;  %v1772_v48 = vmov 0   ;;  %v474_v49 = vld [vmem:[%s2177_s5] sm:$0xff] }
  0x95   : > { %v573_v55 = vsel %vm572_vm5, %v569_v52, %v571_v51  ;;  %v574_v56 = vsel %vm572_vm5, %v571_v51, %v569_v52  ;;  %1744 = vset.pattern.permute.xlu0 %v1772_v48  ;;  %1745 = vset.pattern.permute.xlu1 %v1772_v48  ;;  %v476_v52 = vld [vmem:[%s2179_s7] sm:$0xff] }
  0x96   : > { %v583_v58 = vmul.f32 %v1955_v45, %v573_v55  ;;  %v584_v59 = vmul.f32 %v1958_v46, %v574_v56  ;;  %1694 = vmatprep.subr.bf16.mxu0 %v1693_v53 }
  0x97   : > { %1696 = vmatpush1.bf16.msra.mxu0 %v1695_v54 }
  0x98   : > { %v1697_v61 = vpack.c.bf16 %v584_v59, %v1864_v2  ;;  %v1700_v62 = vpack.c.bf16 %v583_v58, %v1858_v0  ;;  %v590_v63 = vpop.permute.xlu1 %589  ;;  %v588_v1 = vpop.permute.xlu0 %587  ;;  %v1987_v2 = vrot.slane %v1900_v13, %v615_v60 }
  0x99   : > { %v592_v8 = vsel %vm591_vm8, %v588_v1, %v590_v63  ;;  %v593_v10 = vsel %vm591_vm8, %v590_v63, %v588_v1 }
  0x9a   : > { %1699 = vmatprep.subr.msk.bf16.mxu0 %vm1698_vm7, %v1697_v61  ;;  %v602_v12 = vmul.f32 %v1977_v3, %v592_v8  ;;  %v603_v13 = vmul.f32 %v1980_v5, %v593_v10 }
  0x9b   : > { %1702 = vmatpush1.bf16.msk.msra.mxu0 %vm1698_vm7, %v1700_v62  ;;  %v477_v62 = vld [vmem:[%s2180_s8] sm:$0xff] }
  0x9c   : > { %v609_v11 = vpop.permute.xlu1 %608  ;;  %v607_v14 = vpop.permute.xlu0 %606 }
  0x9d   : > { %v611_v15 = vsel %vm610_vm9, %v607_v14, %v609_v11  ;;  %v612_v16 = vsel %vm610_vm9, %v609_v11, %v607_v14 }
  0x9e   : > { %v621_v17 = vmul.f32 %v1984_v7, %v611_v15  ;;  %v622_v22 = vmul.f32 %v1987_v2, %v612_v16 }
  0xa0   : > { %v628_v26 = vpop.permute.xlu1 %627  ;;  %v1703_v27 = vpack.c.bf16 %v622_v22, %v603_v13  ;;  %v626_v30 = vpop.permute.xlu0 %625  ;;  %v1705_v32 = vpack.c.bf16 %v621_v17, %v602_v12 }
  0xa1   : > { %v630_v33 = vsel %vm629_vm10, %v626_v30, %v628_v26  ;;  %v631_v34 = vsel %vm629_vm10, %v628_v26, %v626_v30 }
  0xa2   : > { %1704 = vmatprep.subr.bf16.mxu0 %v1703_v27  ;;  %v641_v35 = vmul.f32 %v2005_v23, %v631_v34  ;;  %v640_v36 = vmul.f32 %v2010_v29, %v630_v33 }
  0xa3   : > { %1706 = vmatpush1.bf16.msra.mxu0 %v1705_v32 }
  0xa4   : > { %682 = vmatprep.subr.mxu0 %v641_v35 }
  0xa7   : > { %683 = vmatpush1.msra.mxu0 %v640_v36 }
  0xa8   : > { %1631 = vmatmul.mubr.msk.f32.vlgmr.msra.gmra.mrb[0].mxu0 %vm662_vm11, %v472_v37  ;;  %1669 = vmatprep.subr.mxu0 %v1767_v4 }
  0xa9   : > { %1671 = vmatprep.mubr.msk.f32.mxu0 %vm1771_vm12, %v1767_v4 }
 0x17b   : > { %v732_v38 = vpop.f32.mrb[0].mxu0 }
 0x17c   : > { %v737_v39 = vmax.f32 %v732_v38, 0.0  ;;  %v734_v40 = vpop.f32.mrb[1].mxu0 }
 0x17d   : > { %v738_v41 = vmax.f32 %v734_v40, 0.0 }
 0x17e   : > { %v742_v42 = vmul.f32 %v737_v39, %v737_v39 }
 0x17f   : > { %v739_v43 = vadd.f32 %v738_v41, %v737_v39  ;;  %v743_v44 = vmul.f32 %v738_v41, %v738_v41 }
 0x181   : > { %740 = vadd.xlane.f32.xlu0 %v739_v43  ;;  %v744_v47 = vadd.f32 %v743_v44, %v742_v42 }
 0x183   : > { %745 = vadd.xlane.f32.xlu1 %v744_v47 }
 0x194   : > { %912 = vperm.xlu1 %1745, %v476_v52  }
 0x20e   : > { %v741_v50 = vpop.xlane.xlu0 %740 }
 0x20f   : > { %1660 = vmatpush3.msra.mxu1 %v741_v50 }
 0x210   : > { %v746_v51 = vpop.xlane.xlu1 %745  ;;  %1662 = vmatmul.mubr.msk.f32.vlgmr.msra.gmra.mrb[0].mxu1 %vm747_vm13, %v474_v49  ;;  %1664 = vmatprep.subr.mxu1 %v1767_v4 }
 0x211   : > { %1665 = vmatpush3.msra.mxu1 %v746_v51  ;;  %1666 = vmatprep.mubr.msk.f32.mxu1 %vm1771_vm12, %v1767_v4 }
 0x214   : > { %1667 = vmatmul.mubr.msk.f32.vlgmr.msra.gmra.mrb[2].mxu1 %vm747_vm13, %v474_v49  ;;  %v913_v63 = vpop.permute.xlu1 %912 }
 0x215   : > { %1091 = vmatprep.mubr.f32.mxu1 %v1767_v4 }
 0x2e3   : > { %v817_v53 = vpop.f32.mrb[0].mxu1 }
 0x2e4   : > { %898 = vperm.xlu0 %1744, %v817_v53   ;;  %v1663_v54 = vpop.f32.mrb[1].mxu1  ;;  %v891_v55 = vmul.f32 %v817_v53, %v817_v53 }
 0x2e7   : > { %v887_v56 = vpop.f32.mrb[2].mxu1 }
 0x2e8   : > { %v892_v57 = vsub.f32 %v887_v56, %v891_v55  ;;  %v1668_v58 = vpop.f32.mrb[3].mxu1 }
 0x2ea   : > { %v893_v59 = vmax.f32 %v892_v57, 0.0 }
 0x2ec   : > { %v894_v60 = vadd.f32 1e-05, %v893_v59 }
 0x2ee   : > { %1747 = vrsqrt.f32 %v894_v60 }
 0x2f8   : > { %v1748_v61 = vpop.eup %1747 }
 0x2f9   : > { %905 = vperm.xlu1 %1745, %v1748_v61  }
 0x2fd   : > { %919 = vperm.xlu1 %1745, %v477_v62  }
 0x363   : > { %v899_v1 = vpop.permute.xlu0 %898 }
 0x364   : > { %v901_v8 = vsub.f32 %v737_v39, %v899_v1  ;;  %v902_v10 = vsub.f32 %v738_v41, %v899_v1 }
 0x378   : > { %v906_v11 = vpop.permute.xlu1 %905 }
 0x379   : > { %v908_v14 = vmul.f32 %v906_v11, %v901_v8  ;;  %v909_v15 = vmul.f32 %v906_v11, %v902_v10 }
 0x37b   : > { %v915_v16 = vmul.f32 %v913_v63, %v908_v14  ;;  %v916_v13 = vmul.f32 %v913_v63, %v909_v15 }
 0x37c   : > { %v920_v12 = vpop.permute.xlu1 %919 }
 0x37d   : > { %v2040_v17 = vadd.f32 %v920_v12, %v915_v16  ;;  %v923_v22 = vadd.f32 %v920_v12, %v916_v13 }
 0x37f   : > { %944 = vrot.lane.b32.xlu0 %v2040_v17, %s1763_s17  ;;  %924 = vrot.lane.b32.xlu1 %v2040_v17, %s1762_s16 }
 0x383   : > { %954 = vrot.lane.b32.xlu0 %v2040_v17, %s1764_s18  ;;  %926 = vrot.lane.b32.xlu1 %v923_v22, %s1762_s16 }
 0x387   : > { %966 = vrot.lane.b32.xlu0 %v2040_v17, %s1765_s19  ;;  %934 = vrot.lane.b32.xlu1 %v2040_v17, %s1761_s15 }
 0x38b   : > { %976 = vrot.lane.b32.xlu0 %v2040_v17, %s1766_s20  ;;  %936 = vrot.lane.b32.xlu1 %v923_v22, %s1761_s15 }
 0x38f   : > { %986 = vrot.lane.b32.xlu0 %v2040_v17, %s1768_s21  ;;  %946 = vrot.lane.b32.xlu1 %v923_v22, %s1763_s17  ;;  %s464_s17 = scalar_lea.vmem %s2185_s13, %s1852_s28 }
 0x393   : > { %996 = vrot.lane.b32.xlu0 %v2040_v17, %s1769_s22  ;;  %956 = vrot.lane.b32.xlu1 %v923_v22, %s1764_s18 }
 0x397   : > { %968 = vrot.lane.b32.xlu1 %v923_v22, %s1765_s19  ;;  %s458_s19 = scalar_lea.vmem %s2173_s1, %s1852_s28 }
 0x39b   : > { %978 = vrot.lane.b32.xlu1 %v923_v22, %s1766_s20 }
 0x39f   : > { %988 = vrot.lane.b32.xlu1 %v923_v22, %s1768_s21 }
 0x3a3   : > { %998 = vrot.lane.b32.xlu1 %v923_v22, %s1769_s22 }
 0x3f1   : > { %v925_v26 = vpop.permute.xlu1 %924  ;;  %v945_v30 = vpop.permute.xlu0 %944 }
 0x3f5   : > { %v927_v27 = vpop.permute.xlu1 %926  ;;  %v955_v35 = vpop.permute.xlu0 %954 }
 0x3f6   : > { %v928_v33 = vsel %vm494_vm2, %v925_v26, %v927_v27  ;;  %v929_v34 = vsel %vm494_vm2, %v927_v27, %v925_v26 }
 0x3f7   : > { %v930_v39 = vmul.f32 %v929_v34, %v1910_v19  ;;  %v931_v40 = vmul.f32 %v928_v33, %v1913_v20 }
 0x3f9   : > { %v935_v32 = vpop.permute.xlu1 %934  ;;  %v967_v48 = vpop.permute.xlu0 %966 }
 0x3fd   : > { %v937_v36 = vpop.permute.xlu1 %936  ;;  %v977_v54 = vpop.permute.xlu0 %976 }
 0x3fe   : > { %v938_v37 = vsel %vm513_vm1, %v935_v32, %v937_v36  ;;  %v939_v38 = vsel %vm513_vm1, %v937_v36, %v935_v32 }
 0x3ff   : > { %v940_v41 = vmul.f32 %v939_v38, %v1907_v18  ;;  %v941_v42 = vmul.f32 %v938_v37, %v1916_v21 }
 0x401   : > { %v1709_v43 = vpack.c.bf16 %v940_v41, %v930_v39  ;;  %v947_v44 = vpop.permute.xlu1 %946  ;;  %v1707_v47 = vpack.c.bf16 %v941_v42, %v931_v40  ;;  %v987_v61 = vpop.permute.xlu0 %986  ;;  %v475_v39 = vld [vmem:[%s2178_s6] sm:$0xf] }
 0x402   : > { %v948_v49 = vsel %vm532_vm3, %v945_v30, %v947_v44  ;;  %v949_v50 = vsel %vm532_vm3, %v947_v44, %v945_v30  ;;  %v478_v44 = vld [vmem:[%s2181_s9] sm:$0xf] }
 0x403   : > { %1708 = vmatprep.subr.bf16.mxu1 %v1707_v47  ;;  %v950_v20 = vmul.f32 %v949_v50, %v1924_v24  ;;  %v951_v21 = vmul.f32 %v948_v49, %v1927_v25 }
 0x404   : > { %1710 = vmatpush1.bf16.msra.mxu1 %v1709_v43 }
 0x405   : > { %v957_v51 = vpop.permute.xlu1 %956  ;;  %v997_v15 = vpop.permute.xlu0 %996 }
 0x406   : > { %v958_v19 = vsel %vm551_vm4, %v955_v35, %v957_v51  ;;  %v959_v18 = vsel %vm551_vm4, %v957_v51, %v955_v35 }
 0x407   : > { %v960_v52 = vmul.f32 %v959_v18, %v1931_v28  ;;  %v961_v53 = vmul.f32 %v958_v19, %v1938_v31 }
 0x409   : > { %v1713_v55 = vpack.c.bf16 %v960_v52, %v950_v20  ;;  %v969_v56 = vpop.permute.xlu1 %968  ;;  %v1711_v57 = vpack.c.bf16 %v961_v53, %v951_v21  ;;  %v1773_v20 = vmov 839922192  }
 0x40a   : > { %v970_v58 = vsel %vm572_vm5, %v967_v48, %v969_v56  ;;  %v971_v59 = vsel %vm572_vm5, %v969_v56, %v967_v48  ;;  %v1280_v21 = vunpack.c.l.s4 %v1773_v20 }
 0x40b   : > { %v972_v60 = vmul.f32 %v970_v58, %v1955_v45  ;;  %v973_v24 = vmul.f32 %v971_v59, %v1958_v46  ;;  %1712 = vmatprep.subr.bf16.mxu1 %v1711_v57 }
 0x40c   : > { %1714 = vmatpush1.bf16.msra.mxu1 %v1713_v55  ;;  %v1281_v52 = vunpack.c.0.s8 %v1280_v21 }
 0x40d   : > { %v1717_v25 = vpack.c.bf16 %v972_v60, %v2040_v17  ;;  %v979_v28 = vpop.permute.xlu1 %978  ;;  %v1715_v31 = vpack.c.bf16 %v973_v24, %v923_v22 }
 0x40e   : > { %v980_v62 = vsel %vm591_vm8, %v977_v54, %v979_v28  ;;  %v981_v63 = vsel %vm591_vm8, %v979_v28, %v977_v54  ;;  %v1284_v53 = vsub.s32 %v1281_v52, %v1886_v6 }
 0x40f   : > { %1716 = vmatprep.subr.bf16.mxu1 %v1715_v31  ;;  %v982_v8 = vmul.f32 %v980_v62, %v1977_v3  ;;  %v983_v10 = vmul.f32 %v981_v63, %v1980_v5  ;;  %v473_v5 = vld [vmem:[%s2176_s4] sm:$0xf] }
 0x410   : > { %1718 = vmatpush1.bf16.msra.mxu1 %v1717_v25 }
 0x411   : > { %v989_v1 = vpop.permute.xlu1 %988 }
 0x412   : > { %v990_v45 = vsel %vm610_vm9, %v987_v61, %v989_v1  ;;  %v991_v46 = vsel %vm610_vm9, %v989_v1, %v987_v61 }
 0x413   : > { %v992_v11 = vmul.f32 %v990_v45, %v1984_v7  ;;  %v993_v14 = vmul.f32 %v991_v46, %v1987_v2  ;;  %v467_v7 = vld [vmem:[%s458_s19] sm:$0xff] }
 0x415   : > { %v1721_v16 = vpack.c.bf16 %v992_v11, %v982_v8  ;;  %v999_v12 = vpop.permute.xlu1 %998  ;;  %v1719_v13 = vpack.c.bf16 %v993_v14, %v983_v10 }
 0x416   : > { %v1001_v17 = vsel %vm629_vm10, %v999_v12, %v997_v15  ;;  %v1000_v22 = vsel %vm629_vm10, %v997_v15, %v999_v12 }
 0x417   : > { %v1003_v26 = vmul.f32 %v2005_v23, %v1001_v17  ;;  %1720 = vmatprep.subr.bf16.mxu1 %v1719_v13  ;;  %v1002_v3 = vmul.f32 %v2010_v29, %v1000_v22 }
 0x418   : > { %1722 = vmatpush1.bf16.msra.mxu1 %v1721_v16 }
 0x419   : > { %1043 = vmatprep.subr.mxu1 %v1003_v26  ;;  %v480_v26 = vld [vmem:[%s2183_s11] sm:$0xf] }
 0x41c   : > { %1044 = vmatpush1.msra.mxu1 %v1002_v3 }
 0x41d   : > { %1634 = vmatmul.mubr.msk.f32.vlgmr.msra.gmra.mrb[4].mxu1 %vm662_vm11, %v473_v5  ;;  %1679 = vmatprep.subr.mxu1 %v1767_v4 }
 0x41e   : > { %1681 = vmatprep.mubr.msk.f32.mxu1 %vm1771_vm12, %v1767_v4 }
 0x4f0   : > { %v1093_v9 = vpop.f32.mrb[4].mxu1 }
 0x4f1   : > { %v1095_v2 = vpop.f32.mrb[5].mxu1 }
 0x4f2   : > { %v1100_v23 = vcombine.low %v1093_v9, %v1095_v2 }
 0x4f4   : > { %v1102_v29 = vadd.f32 %v1100_v23, %v467_v7  ;;  %v481_v23 = vld [vmem:[%s2184_s12] sm:$0xf] }
 0x4f6   : > { %v1104_v27 = vcombine.high %v1102_v29, %v1102_v29  ;;  %v1111_v30 = vmul.f32 %v1102_v29, %v1102_v29  ;;  %v1106_v32 = vsel %vm485_vm0, %v1102_v29, 0.0 }
 0x4f8   : > { %v1107_v33 = vsel %vm485_vm0, %v1104_v27, 0.0  ;;  %v1113_v34 = vcombine.high %v1111_v30, %v1111_v30  ;;  %v1115_v36 = vsel %vm485_vm0, %v1111_v30, 0.0 }
 0x4f9   : > { %v1108_v35 = vadd.f32 %v1107_v33, %v1106_v32 }
 0x4fa   : > { %v1116_v37 = vsel %vm485_vm0, %v1113_v34, 0.0 }
 0x4fb   : > { %1109 = vadd.xlane.f32.xlu0 %v1108_v35  ;;  %v1117_v38 = vadd.f32 %v1116_v37, %v1115_v36 }
 0x4fd   : > { %1118 = vadd.xlane.f32.xlu1 %v1117_v38 }
 0x588   : > { %v1110_v40 = vpop.xlane.xlu0 %1109 }
 0x589   : > { %1670 = vmatpush3.msk.msra.mxu0 %vm485_vm0, %v1110_v40 }
 0x58a   : > { %v1119_v41 = vpop.xlane.xlu1 %1118  ;;  %1672 = vmatmul.mubr.msk.f32.vlgmr.msra.gmra.mrb[2].mxu0 %vm1120_vm14, %v475_v39  ;;  %1674 = vmatprep.subr.mxu0 %v1767_v4 }
 0x58b   : > { %1675 = vmatpush3.msk.msra.mxu0 %vm485_vm0, %v1119_v41  ;;  %1676 = vmatprep.mubr.msk.f32.mxu0 %vm1771_vm12, %v1767_v4 }
 0x58c   : > { %1684 = vmatprep.subr.mxu0 %v1767_v4 }
 0x58e   : > { %1677 = vmatmul.mubr.msk.f32.vlgmr.msra.gmra.mrb[4].mxu0 %vm1120_vm14, %v475_v39 }
 0x58f   : > { %1686 = vmatprep.mubr.msk.f32.mxu0 %vm1771_vm12, %v1767_v4  ;;  %v479_v4 = vld [vmem:[%s2182_s10] sm:$0xf] }
 0x65d   : > { %v1193_v42 = vpop.f32.mrb[2].mxu0 }
 0x65e   : > { %1277 = vperm.xlu0 %1744, %v1193_v42   ;;  %v1673_v43 = vpop.f32.mrb[3].mxu0  ;;  %v1270_v47 = vmul.f32 %v1193_v42, %v1193_v42 }
 0x661   : > { %v1266_v48 = vpop.f32.mrb[4].mxu0 }
 0x662   : > { %v1271_v49 = vsub.f32 %v1266_v48, %v1270_v47  ;;  %1303 = vperm.xlu0 %1744, %v478_v44   ;;  %v1678_v50 = vpop.f32.mrb[5].mxu0 }
 0x664   : > { %v1272_v51 = vmax.f32 %v1271_v49, 0.0 }
 0x666   : > { %v1273_v19 = vadd.f32 1e-05, %v1272_v51 }
 0x668   : > { %1749 = vrsqrt.f32 %v1273_v19 }
 0x672   : > { %v1750_v18 = vpop.eup %1749 }
 0x673   : > { %1290 = vperm.xlu1 %1745, %v1750_v18  }
 0x677   : > { %1316 = vperm.xlu1 %1745, %v479_v4  }
 0x6dd   : > { %v1278_v54 = vpop.permute.xlu0 %1277 }
 0x6de   : > { %v1285_v55 = vrot.slane %v1278_v54, %v1284_v53 }
 0x6e0   : > { %v1287_v58 = vsub.f32 %v1102_v29, %v1285_v55 }
 0x6e1   : > { %v1304_v56 = vpop.permute.xlu0 %1303 }
 0x6e2   : > { %v1311_v60 = vrot.slane %v1304_v56, %v1284_v53 }
 0x6f2   : > { %v1291_v57 = vpop.permute.xlu1 %1290 }
 0x6f3   : > { %v1298_v59 = vrot.slane %v1291_v57, %v1284_v53 }
 0x6f5   : > { %v1300_v24 = vmul.f32 %v1298_v59, %v1287_v58 }
 0x6f6   : > { %v1317_v25 = vpop.permute.xlu1 %1316 }
 0x6f7   : > { %v1313_v28 = vmul.f32 %v1311_v60, %v1300_v24  ;;  %v1324_v31 = vrot.slane %v1317_v25, %v1284_v53 }
 0x6f9   : > { %v1326_v61 = vadd.f32 %v1324_v31, %v1313_v28 }
 0x6fb   : > { %v1327_v62 = vadd.f32 %v1326_v61, %v1858_v0 }
 0x6fd   : > { %v1328_v63 = vmax.f32 %v1327_v62, 0.0 }
 0x6ff   : > { %v1330_v1 = vcombine.high %v1328_v63, %v1328_v63  ;;  %v1337_v45 = vmul.f32 %v1328_v63, %v1328_v63  ;;  %v1332_v46 = vsel %vm485_vm0, %v1328_v63, 0.0 }
 0x701   : > { %v1333_v6 = vsel %vm485_vm0, %v1330_v1, 0.0  ;;  %v1339_v8 = vcombine.high %v1337_v45, %v1337_v45  ;;  %v1341_v11 = vsel %vm485_vm0, %v1337_v45, 0.0 }
 0x702   : > { %v1334_v10 = vadd.f32 %v1333_v6, %v1332_v46 }
 0x703   : > { %v1342_v14 = vsel %vm485_vm0, %v1339_v8, 0.0 }
 0x704   : > { %1335 = vadd.xlane.f32.xlu0 %v1334_v10  ;;  %v1343_v15 = vadd.f32 %v1342_v14, %v1341_v11 }
 0x706   : > { %1344 = vadd.xlane.f32.xlu1 %v1343_v15 }
 0x791   : > { %v1336_v16 = vpop.xlane.xlu0 %1335 }
 0x792   : > { %1680 = vmatpush3.msk.msra.mxu1 %vm485_vm0, %v1336_v16 }
 0x793   : > { %v1345_v0 = vpop.xlane.xlu1 %1344  ;;  %1682 = vmatmul.mubr.msk.f32.vlgmr.msra.gmra.mrb[6].mxu1 %vm1120_vm14, %v475_v39 }
 0x794   : > { %1685 = vmatpush3.msk.msra.mxu0 %vm485_vm0, %v1345_v0 }
 0x795   : > { %1687 = vmatmul.mubr.msk.f32.vlgmr.msra.gmra.mrb[6].mxu0 %vm1120_vm14, %v475_v39 }
 0x866   : > { %v1415_v12 = vpop.f32.mrb[6].mxu1 }
 0x867   : > { %v1492_v13 = vmul.f32 %v1415_v12, %v1415_v12  ;;  %1499 = vperm.xlu0 %1744, %v1415_v12   ;;  %v1683_v17 = vpop.f32.mrb[7].mxu1 }
 0x868   : > { %v1488_v22 = vpop.f32.mrb[6].mxu0 }
 0x869   : > { %v1493_v3 = vsub.f32 %v1488_v22, %v1492_v13  ;;  %v1688_v5 = vpop.f32.mrb[7].mxu0 }
 0x86b   : > { %v1494_v9 = vmax.f32 %v1493_v3, 0.0  ;;  %1525 = vperm.xlu0 %1744, %v480_v26  }
 0x86d   : > { %v1495_v7 = vadd.f32 1e-05, %v1494_v9 }
 0x86f   : > { %1751 = vrsqrt.f32 %v1495_v7 }
 0x879   : > { %v1752_v2 = vpop.eup %1751 }
 0x87a   : > { %1512 = vperm.xlu1 %1745, %v1752_v2  }
 0x87e   : > { %1538 = vperm.xlu1 %1745, %v481_v23  }
 0x8e6   : > { %v1500_v29 = vpop.permute.xlu0 %1499 }
 0x8e7   : > { %v1507_v27 = vrot.slane %v1500_v29, %v1284_v53 }
 0x8e9   : > { %v1509_v33 = vsub.f32 %v1328_v63, %v1507_v27 }
 0x8ea   : > { %v1526_v30 = vpop.permute.xlu0 %1525 }
 0x8eb   : > { %v1533_v35 = vrot.slane %v1526_v30, %v1284_v53 }
 0x8f9   : > { %v1513_v32 = vpop.permute.xlu1 %1512 }
 0x8fa   : > { %v1520_v34 = vrot.slane %v1513_v32, %v1284_v53 }
 0x8fc   : > { %v1522_v36 = vmul.f32 %v1520_v34, %v1509_v33 }
 0x8fd   : > { %v1539_v37 = vpop.permute.xlu1 %1538 }
 0x8fe   : > { %v1535_v38 = vmul.f32 %v1533_v35, %v1522_v36  ;;  %v1546_v39 = vrot.slane %v1539_v37, %v1284_v53 }
 0x900   : > { %v1548_v40 = vadd.f32 %v1546_v39, %v1535_v38 }
 0x902   : > { %1549 = vst [vmem:[%s464_s17] sm:$0xff] %v1548_v40 }
 0x903 PF: > { %s23_s25 = sadd.s32 1, %s1759_s25  }
 0x904   : > { %p20_p4 = scmp.ge.s32.totalorder %s23_s25, 4  }
 0x906   :  { %22 = sbr.rel (!%p20_p4) target bundleno = 1 (0x1), region = 105 }

</bundles_post_ra>
